<compile_context>
chip_gen: v7x
topology: tpu7x:2x2x1
jax: 0.10.0
libtpu: 0.0.40
codegen_flags: <defaults>
</compile_context>

<pallas_src>
import math

import jax
import jax.numpy as jnp
from jax import lax
from jax.experimental import pallas as pl
from jax.experimental.pallas import tpu as pltpu

_GR = 256                        # row-group granularity inside the streaming kernel
_SINGLE_MAX_ELEMS = 512 * 1024   # <= ~2 MiB of f32 temporaries -> single-block kernel


def _cdiv(a, b):
    return -(-a // b)


def _round_up(x, m):
    return ((x + m - 1) // m) * m


def _chip_config():
    """(input_workset_bytes, vmem_limit_bytes, multi_tensorcore) - generation aware."""
    info = None
    try:
        info = pltpu.get_tpu_info()
    except Exception:
        info = None
    cap = getattr(info, "vmem_capacity_bytes", None) if info is not None else None
    multi_tc = False
    if info is not None:
        for name in ("num_cores", "core_count", "num_tensorcores",
                     "tensorcore_count", "cores_per_chip"):
            v = getattr(info, name, None)
            if isinstance(v, int) and v > 1:
                multi_tc = True
                break
    if cap is not None and cap >= (120 << 20) and not multi_tc:
        # v5e / v6e class: 128 MiB VMEM per TensorCore -> big double-buffered tiles.
        return 48 << 20, 64 << 20, multi_tc
    # v7x (64 MiB per TC) or unknown chip: conservative budget that fits everywhere.
    return 26 << 20, 40 << 20, multi_tc


def _choose_layout(shape, n, itemsize, workset):
    """Pick a free-reshape 2-D view (L, C) of the flattened operands.

    Returns (L, C, pad_elems).  pad_elems > 0 only on the rare fallback path.
    """
    if n % 128 == 0:
        for lw in (512, 256, 128):            # lane-dense view, widest first
            if n % lw == 0:
                return n // lw, lw, 0
    if len(shape) >= 2:
        c = int(shape[-1])
        l = n // c
        c_pad = _round_up(c, 128)
        fits_stream = 4 * 32 * c_pad * itemsize <= workset   # a 32-row block fits
        fits_single = l * c_pad <= _SINGLE_MAX_ELEMS
        if fits_stream or fits_single:
            return l, c, 0                     # free reshape: collapse leading dims
    elif _round_up(max(n, 1), 128) <= _SINGLE_MAX_ELEMS:
        return 1, max(n, 1), 0                 # small 0-D / 1-D ragged: one block
    # TODO(synk): huge ragged inputs with no cheap 2-D view still pay one
    # zero-pad copy (<=127 elements appended to each flattened operand).
    pad = (-n) % 128
    return (n + pad) // 128, 128, pad


def _single_block_kernel(p_ref, t_ref, o_ref):
    d = p_ref[...].astype(jnp.float32) - t_ref[...].astype(jnp.float32)
    o_ref[...] = jnp.broadcast_to(jnp.sum(d * d), o_ref.shape)


def _make_stream_kernel(rows, bl, c, gr, nb_per, needs_mask):
    groups = bl // gr

    def kernel(p_ref, t_ref, o_ref, acc_ref):
        part = pl.program_id(0)           # TensorCore / part axis ("parallel")
        i = pl.program_id(1)              # row-block axis         ("arbitrary")

        @pl.when(i == 0)
        def _():
            acc_ref[...] = jnp.zeros_like(acc_ref)

        row0 = (part * nb_per + i) * bl

        def make_body(masked):
            def body(g, carry):
                start = pl.multiple_of(g * gr, gr)
                pg = p_ref[pl.ds(start, gr), :].astype(jnp.float32)
                tg = t_ref[pl.ds(start, gr), :].astype(jnp.float32)
                d = pg - tg
                sq = d * d
                if masked:
                    ridx = row0 + start + lax.broadcasted_iota(
                        jnp.int32, (gr, 1), 0)
                    sq = jnp.where(ridx < rows, sq, 0.0)
                acc_ref[...] += sq        # pure VPU adds into a small scratch
                return carry
            return body

        if needs_mask:
            oob = row0 + bl > rows
            @pl.when(oob)                  # boundary / clamped blocks only
            def _():
                lax.fori_loop(0, groups, make_body(True), 0)

            @pl.when(jnp.logical_not(oob))  # interior blocks: unmasked fast path
            def _():
                lax.fori_loop(0, groups, make_body(False), 0)
        else:
            lax.fori_loop(0, groups, make_body(False), 0)

        @pl.when(i == pl.num_programs(1) - 1)
        def _():
            o_ref[...] = jnp.broadcast_to(jnp.sum(acc_ref[...]), o_ref.shape)

    return kernel


def rmse_loss(pred: jax.Array, target: jax.Array, *, max_block_rows=None) -> jax.Array:
    """sqrt(mean((pred - target)**2)) - matches torch.sqrt(nn.MSELoss()(pred, target))."""
    assert pred.shape == target.shape, "pred/target must match (MSELoss default)"
    n = int(math.prod(pred.shape)) if pred.ndim > 0 else 1

    out_dtype = jnp.result_type(pred.dtype, target.dtype)
    if not jnp.issubdtype(out_dtype, jnp.floating):
        out_dtype = jnp.float32
    if n == 0:
        return jnp.array(float("nan"), dtype=out_dtype)

    itemsize = max(jnp.dtype(pred.dtype).itemsize, jnp.dtype(target.dtype).itemsize)
    workset, vmem_limit, multi_tc = _chip_config()

    L, C, pad = _choose_layout(pred.shape, n, itemsize, workset)
    p_flat = pred.reshape(-1)
    t_flat = target.reshape(-1)
    if pad:
        p_flat = jnp.pad(p_flat, (0, pad))
        t_flat = jnp.pad(t_flat, (0, pad))
    p2d = p_flat.reshape(L, C)
    t2d = t_flat.reshape(L, C)

    rows = L
    c_pad = _round_up(C, 128)
    cost = pl.CostEstimate(flops=3 * n, transcendentals=0,
                           bytes_accessed=2 * n * itemsize + 2 * 8 * 128 * 4)

    # ---- small problems: one block, direct full reduction -------------------
    use_single = (rows * c_pad <= _SINGLE_MAX_ELEMS) or rows < 32
    if max_block_rows is not None and rows >= 32 and rows > max(1, int(max_block_rows)):
        use_single = False                                  # test hook: force streaming
    if use_single:
        out = pl.pallas_call(
            _single_block_kernel,
            out_shape=jax.ShapeDtypeStruct((8, 128), jnp.float32),
            grid=(1,),
            in_specs=[pl.BlockSpec((rows, C), lambda i: (0, 0)),
                      pl.BlockSpec((rows, C), lambda i: (0, 0))],
            out_specs=pl.BlockSpec((8, 128), lambda i: (0, 0)),
            compiler_params=pltpu.CompilerParams(vmem_limit_bytes=int(vmem_limit)),
            cost_estimate=cost,
        )(p2d, t2d)
        return jnp.sqrt(out[0, 0] / jnp.float32(n)).astype(out_dtype)

    # ---- large problems: streaming accumulation over row blocks -------------
    per_row = 4 * c_pad * itemsize                  # 2 inputs x 2 pipeline buffers
    tr = workset // per_row
    if max_block_rows is not None:
        tr = min(tr, max(32, int(max_block_rows)))
    tr = min(tr, rows)
    if tr >= _GR:
        bl = (tr // _GR) * _GR
    else:
        bl = max(32, (tr // 32) * 32)
    gr = min(_GR, bl)                               # in-kernel row-group size

    nb_total = _cdiv(rows, bl)
    if nb_total <= 1:
        num_parts = 1
    elif nb_total % 2 == 0 or multi_tc:
        num_parts = 2                               # free split / multi-TensorCore chip
    else:
        num_parts = 1
    nb_per = _cdiv(nb_total, num_parts)
    needs_mask = (num_parts * nb_per * bl) != rows

    def in_map(part, i):
        # Clamp fully out-of-range block indices; the kernel masks them to zero.
        return (jnp.minimum(part * nb_per + i, nb_total - 1), 0)

    needed = 4 * bl * c_pad * itemsize + 4 * gr * c_pad * 4 + (4 << 20)
    out = pl.pallas_call(
        _make_stream_kernel(rows, bl, C, gr, nb_per, needs_mask),
        out_shape=jax.ShapeDtypeStruct((num_parts, 8, 128), jnp.float32),
        grid_spec=pltpu.PrefetchScalarGridSpec(
            num_scalar_prefetch=0,
            grid=(num_parts, nb_per),
            in_specs=[pl.BlockSpec((bl, C), in_map),
                      pl.BlockSpec((bl, C), in_map)],
            out_specs=pl.BlockSpec((1, 8, 128), lambda part, i: (part, 0, 0)),
            scratch_shapes=[pltpu.VMEM((gr, C), jnp.float32)],
        ),
        compiler_params=pltpu.CompilerParams(
            dimension_semantics=("parallel", "arbitrary"),
            vmem_limit_bytes=int(max(vmem_limit, needed)),
        ),
        cost_estimate=cost,
    )(p2d, t2d)

    total = jnp.sum(out[:, 0, 0])                   # per-part partial sums
    return jnp.sqrt(total / jnp.float32(n)).astype(out_dtype)


if __name__ == "__main__":
    key = jax.random.PRNGKey(0)
    ks = jax.random.split(key, 8)

    # 1) Basic NCHW case (aligned, lane-dense, single-block path).
    pred = jax.random.normal(ks[0], (2, 4, 16, 16), dtype=jnp.float32)
    target = jax.random.normal(ks[1], (2, 4, 16, 16), dtype=jnp.float32)
    loss = rmse_loss(pred, target)
    jax.block_until_ready(loss)
    ref = jnp.sqrt(jnp.mean((pred - target) ** 2))
    assert jnp.allclose(loss, ref, rtol=1e-5, atol=1e-6), (loss, ref)

    # 2) Ragged element count (no host-side pad: free (L, last_dim) view).
    pred_r = jax.random.normal(ks[2], (2, 3, 17, 19), dtype=jnp.float32)
    target_r = jax.random.normal(ks[3], (2, 3, 17, 19), dtype=jnp.float32)
    loss_r = rmse_loss(pred_r, target_r)
    jax.block_until_ready(loss_r)
    ref_r = jnp.sqrt(jnp.mean((pred_r - target_r) ** 2))
    assert jnp.allclose(loss_r, ref_r, rtol=1e-5, atol=1e-6), (loss_r, ref_r)

    # 3) Streaming path: multi-block, 2-part split, masked partial boundary block.
    pred_m = jax.random.normal(ks[4], (3, 4, 64, 63), dtype=jnp.float32)
    target_m = jax.random.normal(ks[5], (3, 4, 64, 63), dtype=jnp.float32)
    loss_m = rmse_loss(pred_m, target_m, max_block_rows=32)
    jax.block_until_ready(loss_m)
    ref_m = jnp.sqrt(jnp.mean((pred_m - target_m) ** 2))
    assert jnp.allclose(loss_m, ref_m, rtol=1e-5, atol=1e-6), (loss_m, ref_m)

    # 4) Small ragged 1-D input (single full-array block, no pad).
    pred_v = jax.random.normal(ks[6], (97,), dtype=jnp.float32)
    target_v = jax.random.normal(ks[7], (97,), dtype=jnp.float32)
    loss_v = rmse_loss(pred_v, target_v)
    jax.block_until_ready(loss_v)
    ref_v = jnp.sqrt(jnp.mean((pred_v - target_v) ** 2))
    assert jnp.allclose(loss_v, ref_v, rtol=1e-5, atol=1e-6), (loss_v, ref_v)

    print("KERNEL_OK")
</pallas_src>

<mosaic_0001>
module attributes {stable_mosaic.version = 11 : i64} {
  func.func @_single_block_kernel(%arg0: i32, %arg1: memref<4x512xf32, #tpu.memory_space<vmem>>, %arg2: memref<4x512xf32, #tpu.memory_space<vmem>>, %arg3: memref<8x128xf32, #tpu.memory_space<vmem>>) attributes {dimension_semantics = [#tpu.dimension_semantics<arbitrary>], iteration_bounds = array<i64: 1>, scalar_prefetch = 0 : i64, scratch_operands = 0 : i64, tpu.core_type = #tpu.core_type<tc>, window_params = [{pipeline_mode = #tpu.pipeline_mode<synchronous>, transform_indices = @transform_0, window_bounds = array<i64: 4, 512>}, {pipeline_mode = #tpu.pipeline_mode<synchronous>, transform_indices = @transform_1, window_bounds = array<i64: 4, 512>}, {pipeline_mode = #tpu.pipeline_mode<synchronous>, transform_indices = @transform_2, window_bounds = array<i64: 8, 128>}]} {
    %c0 = arith.constant 0 : index
    %c0_0 = arith.constant 0 : index
    %0 = vector.load %arg1[%c0, %c0_0] : memref<4x512xf32, #tpu.memory_space<vmem>>, vector<4x512xf32>
    %c0_1 = arith.constant 0 : index
    %c0_2 = arith.constant 0 : index
    %1 = vector.load %arg2[%c0_1, %c0_2] : memref<4x512xf32, #tpu.memory_space<vmem>>, vector<4x512xf32>
    %2 = arith.subf %0, %1 : vector<4x512xf32>
    %3 = arith.mulf %2, %2 : vector<4x512xf32>
    %4 = vector.shape_cast %3 : vector<4x512xf32> to vector<1x4x512xf32>
    %cst = arith.constant dense<0.000000e+00> : vector<1xf32>
    %5 = vector.multi_reduction <add>, %4, %cst [1, 2] : vector<1x4x512xf32> to vector<1xf32>
    %6 = vector.shape_cast %5 : vector<1xf32> to vector<1x1x1xf32>
    %7 = vector.extract %6[0, 0, 0] : f32 from vector<1x1x1xf32>
    %8 = vector.broadcast %7 : f32 to vector<8x128xf32>
    %c0_3 = arith.constant 0 : index
    %c0_4 = arith.constant 0 : index
    %9 = vector.load %arg3[%c0_3, %c0_4] : memref<8x128xf32, #tpu.memory_space<vmem>>, vector<8x128xf32>
    tpu.vector_store %arg3[%c0_3, %c0_4], %8 {strides = array<i32>} : memref<8x128xf32, #tpu.memory_space<vmem>>, vector<8x128xf32>,
    return
  }
  func.func @transform_0(%arg0: i32) -> (i32, i32) {
    %c0_i32 = arith.constant 0 : i32
    %c0_i32_0 = arith.constant 0 : i32
    %c0_i32_1 = arith.constant 0 : i32
    return %c0_i32, %c0_i32_0 : i32, i32
  }
  func.func @transform_1(%arg0: i32) -> (i32, i32) {
    %c0_i32 = arith.constant 0 : i32
    %c0_i32_0 = arith.constant 0 : i32
    %c0_i32_1 = arith.constant 0 : i32
    return %c0_i32, %c0_i32_0 : i32, i32
  }
  func.func @transform_2(%arg0: i32) -> (i32, i32) {
    %c0_i32 = arith.constant 0 : i32
    %c0_i32_0 = arith.constant 0 : i32
    %c0_i32_1 = arith.constant 0 : i32
    return %c0_i32, %c0_i32_0 : i32, i32
  }
}

</mosaic_0001>

<bundles_post_ra>
// kernel: tpu_custom_call.1
= control target key start
LH: loop header
LB: loop body
LE: loop exit
PB: predicated region body
PF: predicated region fallthrough
CT: control target
= control target key end

     0   :  { %7 = vsyncpa [#allocation3], 0  ;;  %s216_s0 = inlined_call_operand.hbm [shape: f32[4,512], index: 0, kind: input, shape index: {}]   ;;  %s217_s1 = inlined_call_operand.hbm [shape: f32[4,512], index: 1, kind: input, shape index: {}]   ;;  %s218_s2 = inlined_call_operand.hbm [shape: f32[8,128], index: 2, kind: output, shape index: {}]  }
   0x1   :  { %8 = vsyncpa [#allocation6], 0 }
   0x2   :  { %9 = vsyncpa [#allocation4], 0  ;;  %s162_s9 = smov [#allocation2]   ;;  %s163_s11 = smov [#allocation5]  }
   0x3   :  { %s16_s10 = sshll.u32 %s162_s9, 4  ;;  %s26_s12 = sshll.u32 %s163_s11, 4  ;;  %s17_s10 = int_to_ptr.vmem [resolvable:$true] %s16_s10  ;;  %s27_s12 = int_to_ptr.vmem [resolvable:$true] %s26_s12 }
   0x4   :  { %s90_s15 = scalar_lea.hbm %s216_s0, 256 }
   0x5   :  { %p91_p0 = scmp.ne.s32.totalorder %s216_s0, %s90_s15  ;;  %p94_p1 = scmp.lt.u32.totalorder %s90_s15, %s216_s0 }
   0x7   :  { %p96_p2 = pnand %p94_p1, %p91_p0 }
   0x9   :  { %99 = shalt.err (!%p96_p2)
}
   0xa   :  { %s100_s20 = scalar_lea.vmem %s17_s10, 256  ;;  %p105_p4 = scmp.lt.s32.totalorder %s17_s10, %s17_s10 }
   0xb   :  { %p101_p3 = scmp.ne.s32.totalorder %s17_s10, %s100_s20  ;;  %p106_p5 = scmp.lt.s32.totalorder %s100_s20, %s100_s20 }
   0xd   :  { %p107_p6 = por %p106_p5, %p105_p4 }
   0xf   :  { %p108_p7 = pnand %p107_p6, %p101_p3 }
  0x11   :  { %111 = shalt.err (!%p108_p7)
}
  0x12   :  { %19 = dma.hbm_to_vmem [thread:$0]  %s216_s0, 256, %s17_s10, [#allocation3]  }
  0x13   :  { %s112_s25 = scalar_lea.hbm %s217_s1, 256 }
  0x14   :  { %p113_p8 = scmp.ne.s32.totalorder %s217_s1, %s112_s25  ;;  %p116_p9 = scmp.lt.u32.totalorder %s112_s25, %s217_s1 }
  0x16   :  { %p118_p10 = pnand %p116_p9, %p113_p8 }
  0x18   :  { %121 = shalt.err (!%p118_p10)
}
  0x19   :  { %s122_s30 = scalar_lea.vmem %s27_s12, 256  ;;  %p127_p12 = scmp.lt.s32.totalorder %s27_s12, %s27_s12 }
  0x1a   :  { %p123_p11 = scmp.ne.s32.totalorder %s27_s12, %s122_s30  ;;  %p128_p13 = scmp.lt.s32.totalorder %s122_s30, %s122_s30 }
  0x1c   :  { %p129_p0 = por %p128_p13, %p127_p12 }
  0x1e   :  { %p130_p1 = pnand %p129_p0, %p123_p11 }
  0x20   :  { %133 = shalt.err (!%p130_p1)
}
  0x21   :  { %29 = dma.hbm_to_vmem [thread:$0]  %s217_s1, 256, %s27_s12, [#allocation6]  }
  0x22   :  { %156 = dma.done.wait [#allocation3], 256  }
  0x23   :  { %157 = vsyncadd [#allocation3], 4294967040 }
  0x24   :  { %158 = dma.done.wait [#allocation6], 256  }
  0x25   :  { %159 = vsyncadd [#allocation6], 4294967040  ;;  %v36_v0 = vld [vmem:[#allocation2] sm:$0xff]  ;;  %v37_v1 = vld [vmem:[#allocation2 + $0x8] sm:$0xff]  ;;  %vm50_vm0 = vcmask 1043456   ;;  %s164_s1 = smov [#allocation7]  }
  0x26   :  { %v38_v2 = vld [vmem:[#allocation5] sm:$0xff]  ;;  %v39_v3 = vld [vmem:[#allocation5 + $0x8] sm:$0xff]  ;;  %s75_s4 = sshll.u32 %s164_s1, 4  ;;  %s76_s4 = int_to_ptr.vmem [resolvable:$true] %s75_s4 }
  0x27   :  { %v40_v4 = vsub.f32 %v36_v0, %v38_v2  ;;  %v41_v5 = vsub.f32 %v37_v1, %v39_v3  ;;  %s134_s6 = scalar_lea.vmem %s76_s4, 128  ;;  %p139_p3 = scmp.lt.s32.totalorder %s76_s4, %s76_s4 }
  0x28   :  { %p135_p2 = scmp.ne.s32.totalorder %s76_s4, %s134_s6  ;;  %p140_p4 = scmp.lt.s32.totalorder %s134_s6, %s134_s6 }
  0x29   :  { %v42_v6 = vmul.f32 %v40_v4, %v40_v4  ;;  %v43_v7 = vmul.f32 %v41_v5, %v41_v5 }
  0x2a   :  { %p141_p5 = por %p140_p4, %p139_p3 }
  0x2b   :  { %v46_v8 = vcombine.high %v42_v6, %v42_v6  ;;  %v51_v9 = vsel %vm50_vm0, %v42_v6, 0.0  ;;  %v47_v10 = vcombine.high %v43_v7, %v43_v7  ;;  %v54_v12 = vsel %vm50_vm0, %v43_v7, 0.0 }
  0x2c   :  { %p142_p6 = pnand %p141_p5, %p135_p2 }
  0x2d   :  { %v52_v11 = vsel %vm50_vm0, %v46_v8, 0.0  ;;  %v56_v14 = vsel %vm50_vm0, %v47_v10, 0.0 }
  0x2e   :  { %v53_v13 = vadd.f32 %v52_v11, %v51_v9 }
  0x30   :  { %v55_v15 = vadd.f32 %v54_v12, %v53_v13 }
  0x32   :  { %v57_v16 = vadd.f32 %v56_v14, %v55_v15 }
  0x34   :  { %58 = vadd.xlane.f32.xlu0 %v57_v16 }
  0xc1   :  { %v59_v17 = vpop.xlane.xlu0 %58 }
  0xc2   :  { %v60_v18 = vrot.slane %v59_v17, 4 }
  0xc4   :  { %v61_v19 = vadd.f32 %v60_v18, %v59_v17 }
  0xc6   :  { %v62_v20 = vrot.slane %v61_v19, 2 }
  0xc8   :  { %v63_v21 = vadd.f32 %v62_v20, %v61_v19 }
  0xca   :  { %v64_v22 = vrot.slane %v63_v21, 1 }
  0xcc   :  { %v65_v23 = vadd.f32 %v64_v22, %v63_v21 }
  0xce   :  { %85 = vpush %v65_v23 }
  0xff   :  { %s86_s5 = spop %85 }
 0x100   :  { %v67_v24 = vstv %s86_s5 }
 0x101   :  { %68 = vst [vmem:[#allocation7] sm:$0xff] %v67_v24 }
 0x102   :  { %145 = shalt.err (!%p142_p6)
}
 0x103   :  { %s146_s9 = scalar_lea.hbm %s218_s2, 128 }
 0x104   :  { %p147_p7 = scmp.ne.s32.totalorder %s218_s2, %s146_s9  ;;  %p150_p8 = scmp.lt.u32.totalorder %s146_s9, %s218_s2 }
 0x106   :  { %p152_p9 = pnand %p150_p8, %p147_p7 }
 0x108   :  { %155 = shalt.err (!%p152_p9)
}
 0x109   :  { %78 = dma.vmem_to_hbm [thread:$0]  %s76_s4, 128, %s218_s2, [#allocation4]  }
 0x10a   :  { %160 = dma.done.wait [#allocation4], 128  }
 0x10b   :  { %161 = vsyncadd [#allocation4], 4294967168 }
 0x10c   :  { %82 = vsyncpa [#allocation3], 1 }
 0x10d   :  { %83 = vsyncpa [#allocation6], 1 }
 0x10e   :  { %84 = vsyncpa [#allocation4], 1 }

</bundles_post_ra>
